<compile_context>
chip_gen: v5e
topology: v5e:2x2
jax: 0.10.0
libtpu: 0.0.40
codegen_flags: <defaults>
</compile_context>

<pallas_src>
import functools

import jax
import jax.numpy as jnp
import numpy as np
from jax.experimental import pallas as pl
from jax.experimental.pallas import tpu as pltpu


# ---------------------------------------------------------------------------
# Tiling helper: bound block bytes (~2 MiB) so 2x(in+out) double buffering fits
# every generation's scoped VMEM (v5e 16 MiB default, v7x 64 MiB physical),
# while keeping >=2 parallel grid points for megacore sharding when possible.
# ---------------------------------------------------------------------------
_LANE_TILE_CAP = 2048                 # lanes per block (multiple of 128)
_TARGET_BLOCK_BYTES = 2 * 1024 * 1024  # ~2 MiB per block


def _choose_tiles(N, C, HW, itemsize):
    thw = HW if HW <= _LANE_TILE_CAP else _LANE_TILE_CAP
    n_hw = pl.cdiv(HW, thw)
    block_bytes = C * thw * itemsize
    bn = max(1, min(N, _TARGET_BLOCK_BYTES // max(block_bytes, 1)))
    # Keep at least 2 grid points when possible so both v7x TensorCores work.
    while bn > 1 and pl.cdiv(N, bn) * n_hw < 2:
        bn -= 1
    return bn, thw, n_hw


# ---------------------------------------------------------------------------
# Kernel 1: channel softmax * scale  (the softmax=True path — the hot path)
# Block: (BN, C, THW).  Softmax is over C, so batch/lane tiles are independent.
# ---------------------------------------------------------------------------
def _channel_softmax_kernel(x_ref, o_ref, *, scale):
    x = x_ref[...].astype(jnp.float32)              # (BN, C, THW)
    m = jnp.max(x, axis=1, keepdims=True)           # (BN, 1, THW)
    e = jnp.exp(x - m)                               # (BN, C, THW)
    s = jnp.sum(e, axis=1, keepdims=True)            # (BN, 1, THW)
    inv = scale / s                                   # row-wise divide (BN, 1, THW)
    o_ref[...] = (e * inv).astype(o_ref.dtype)       # single broadcast multiply


# ---------------------------------------------------------------------------
# Kernel 2: avg/max pool over spatial (HW-tiled reduction) + shared MLP + sigmoid
#           (the softmax=False path).  Grid = (N, n_hw_tiles), last axis is the
#           reduction axis; sums/maxes accumulate in VMEM scratch and the tiny
#           MLP runs once on the final tile.
# ---------------------------------------------------------------------------
def _channel_pool_mlp_kernel(x_ref, w1_ref, w2_ref, o_ref, sum_acc, max_acc,
                             *, hw, thw):
    k = pl.program_id(1)

    @pl.when(k == 0)
    def _():
        sum_acc[...] = jnp.zeros_like(sum_acc)
        max_acc[...] = jnp.full_like(max_acc, -jnp.inf)

    x = x_ref[0].astype(jnp.float32)                             # (C, THW)
    lane = jax.lax.broadcasted_iota(jnp.int32, x.shape, 1)        # (C, THW)
    valid = (lane + k * thw) < hw                                 # mask edge tile
    sum_acc[...] += jnp.sum(jnp.where(valid, x, 0.0), axis=1, keepdims=True)
    max_acc[...] = jnp.maximum(
        max_acc[...],
        jnp.max(jnp.where(valid, x, -jnp.inf), axis=1, keepdims=True))

    @pl.when(k == pl.num_programs(1) - 1)
    def _():
        avg = sum_acc[...] * (1.0 / hw)                           # (C, 1) true HW
        pooled = jnp.concatenate([avg, max_acc[...]], axis=1)     # (C, 2)
        w1 = w1_ref[...].astype(jnp.float32)                      # (Cr, C)
        w2 = w2_ref[...].astype(jnp.float32)                      # (C, Cr)
        # One matmul chain for both pooled vectors (shared fc, bias=False).
        h = jnp.maximum(
            jax.lax.dot_general(w1, pooled, (((1,), (0,)), ((), ())),
                                preferred_element_type=jnp.float32), 0.0)  # (Cr, 2)
        # Contract h's Cr with w2's Cr -> (2, C): lane-dense result rows.
        y = jax.lax.dot_general(h, w2, (((0,), (1,)), ((), ())),
                                preferred_element_type=jnp.float32)        # (2, C)
        att = jax.nn.sigmoid(y[0:1, :] + y[1:2, :])               # (1, C)
        o_ref[0] = att.astype(o_ref.dtype)                        # lane-dense store


# ---------------------------------------------------------------------------
# Wrapper
# ---------------------------------------------------------------------------
def cam_forward(x, w1, w2, *, softmax=True):
    """x: (N, C, H, W); w1: (C//ratio, C); w2: (C, C//ratio)."""
    N, C, H, W = x.shape
    HW = H * W
    itemsize = jnp.dtype(x.dtype).itemsize
    x2 = x.reshape(N, C, HW)

    if softmax:
        bn, thw, n_hw = _choose_tiles(N, C, HW, itemsize)
        nb = pl.cdiv(N, bn)
        scale = 0.25 * C
        out = pl.pallas_call(
            functools.partial(_channel_softmax_kernel, scale=scale),
            out_shape=jax.ShapeDtypeStruct((N, C, HW), x.dtype),
            grid_spec=pltpu.PrefetchScalarGridSpec(
                num_scalar_prefetch=0,
                grid=(nb, n_hw),
                in_specs=[pl.BlockSpec((bn, C, thw), lambda b, k: (b, 0, k))],
                out_specs=pl.BlockSpec((bn, C, thw), lambda b, k: (b, 0, k)),
            ),
            compiler_params=pltpu.CompilerParams(
                dimension_semantics=("parallel", "parallel"),
                vmem_limit_bytes=32 * 1024 * 1024),
            cost_estimate=pl.CostEstimate(
                flops=5 * N * C * HW,
                transcendentals=N * C * HW,
                bytes_accessed=2 * N * C * HW * itemsize),
        )(x2)
        return out.reshape(N, C, H, W)

    # sigmoid path: pooled channel-attention MLP, output (N, C, 1, 1)
    _, thw, n_hw = _choose_tiles(1, C, HW, itemsize)
    out = pl.pallas_call(
        functools.partial(_channel_pool_mlp_kernel, hw=HW, thw=thw),
        out_shape=jax.ShapeDtypeStruct((N, 1, C), x.dtype),   # lane-dense output
        grid_spec=pltpu.PrefetchScalarGridSpec(
            num_scalar_prefetch=0,
            grid=(N, n_hw),
            in_specs=[
                pl.BlockSpec((1, C, thw), lambda n, k: (n, 0, k)),
                pl.BlockSpec(w1.shape, lambda n, k: (0, 0)),
                pl.BlockSpec(w2.shape, lambda n, k: (0, 0)),
            ],
            out_specs=pl.BlockSpec((1, 1, C), lambda n, k: (n, 0, 0)),
            scratch_shapes=[pltpu.VMEM((C, 1), jnp.float32),   # running sum
                            pltpu.VMEM((C, 1), jnp.float32)],  # running max
        ),
        compiler_params=pltpu.CompilerParams(
            dimension_semantics=("parallel", "arbitrary"),
            vmem_limit_bytes=32 * 1024 * 1024),
        cost_estimate=pl.CostEstimate(
            flops=3 * N * C * HW,
            transcendentals=N * C,
            bytes_accessed=N * C * HW * itemsize + N * C * itemsize),
    )(x2, w1, w2)
    return out.reshape(N, C, 1, 1)


# ---------------------------------------------------------------------------
# Pure-JAX reference (mirrors the PyTorch forward)
# ---------------------------------------------------------------------------
def cam_ref(x, w1, w2, *, softmax=True):
    N, C, H, W = x.shape
    if softmax:
        return jax.nn.softmax(x, axis=1) * (0.25 * C)
    xa = jnp.mean(x, axis=(2, 3))   # (N, C)
    xm = jnp.max(x, axis=(2, 3))    # (N, C)

    def fc(v):
        return jnp.maximum(v @ w1.T, 0.0) @ w2.T

    out = jax.nn.sigmoid(fc(xa) + fc(xm))
    return out.reshape(N, C, 1, 1)


def _check_case(key, N, C, H, W, ratio):
    kx, k1, k2 = jax.random.split(key, 3)
    x = jax.random.normal(kx, (N, C, H, W), dtype=jnp.float32)
    w1 = jax.random.normal(k1, (C // ratio, C), dtype=jnp.float32) * 0.2
    w2 = jax.random.normal(k2, (C, C // ratio), dtype=jnp.float32) * 0.2

    out_sm = jax.block_until_ready(cam_forward(x, w1, w2, softmax=True))
    ref_sm = cam_ref(x, w1, w2, softmax=True)
    assert out_sm.shape == (N, C, H, W)
    np.testing.assert_allclose(np.asarray(out_sm), np.asarray(ref_sm),
                               rtol=1e-5, atol=1e-5)

    out_sg = jax.block_until_ready(cam_forward(x, w1, w2, softmax=False))
    ref_sg = cam_ref(x, w1, w2, softmax=False)
    assert out_sg.shape == (N, C, 1, 1)
    np.testing.assert_allclose(np.asarray(out_sg), np.asarray(ref_sg),
                               rtol=1e-5, atol=1e-5)


if __name__ == "__main__":
    key = jax.random.PRNGKey(0)
    k0, k1, k2 = jax.random.split(key, 3)

    # Main case (matches module defaults: ratio=4).
    _check_case(k0, N=2, C=8, H=16, W=16, ratio=4)
    # Lane tiling + partial lane tile + batch-blocked softmax (HW=2304 > 2048).
    _check_case(k1, N=2, C=8, H=48, W=48, ratio=4)
    # Batch-edge padding in the batch-blocked softmax path.
    _check_case(k2, N=3, C=8, H=4, W=4, ratio=4)

    print("KERNEL_OK")
</pallas_src>

<mosaic_0001>
module attributes {stable_mosaic.version = 11 : i64} {
  func.func @_channel_softmax_kernel(%arg0: i32, %arg1: i32, %arg2: memref<1x8x256xf32, #tpu.memory_space<vmem>>, %arg3: memref<1x8x256xf32, #tpu.memory_space<vmem>>) attributes {dimension_semantics = [#tpu.dimension_semantics<parallel>, #tpu.dimension_semantics<parallel>], iteration_bounds = array<i64: 2, 1>, scalar_prefetch = 0 : i64, scratch_operands = 0 : i64, tpu.core_type = #tpu.core_type<tc>, window_params = [{transform_indices = @transform_0, window_bounds = array<i64: 1, 8, 256>}, {transform_indices = @transform_1, window_bounds = array<i64: 1, 8, 256>}]} {
    %c0 = arith.constant 0 : index
    %c0_0 = arith.constant 0 : index
    %c0_1 = arith.constant 0 : index
    %0 = vector.load %arg2[%c0, %c0_0, %c0_1] : memref<1x8x256xf32, #tpu.memory_space<vmem>>, vector<1x8x256xf32>
    %cst = arith.constant dense<0xFF800000> : vector<1x256xf32>
    %1 = vector.multi_reduction <maximumf>, %0, %cst [1] : vector<1x8x256xf32> to vector<1x256xf32>
    %2 = vector.shape_cast %1 : vector<1x256xf32> to vector<1x1x256xf32>
    %3 = vector.broadcast %2 : vector<1x1x256xf32> to vector<1x8x256xf32>
    %4 = arith.subf %0, %3 : vector<1x8x256xf32>
    %5 = math.exp %4 : vector<1x8x256xf32>
    %cst_2 = arith.constant dense<0.000000e+00> : vector<1x256xf32>
    %6 = vector.multi_reduction <add>, %5, %cst_2 [1] : vector<1x8x256xf32> to vector<1x256xf32>
    %7 = vector.shape_cast %6 : vector<1x256xf32> to vector<1x1x256xf32>
    %cst_3 = arith.constant 2.000000e+00 : f32
    %8 = vector.broadcast %cst_3 : f32 to vector<1x1x256xf32>
    %9 = arith.divf %8, %7 : vector<1x1x256xf32>
    %10 = vector.broadcast %9 : vector<1x1x256xf32> to vector<1x8x256xf32>
    %11 = arith.mulf %5, %10 : vector<1x8x256xf32>
    %c0_4 = arith.constant 0 : index
    %c0_5 = arith.constant 0 : index
    %c0_6 = arith.constant 0 : index
    %12 = vector.load %arg3[%c0_4, %c0_5, %c0_6] : memref<1x8x256xf32, #tpu.memory_space<vmem>>, vector<1x8x256xf32>
    tpu.vector_store %arg3[%c0_4, %c0_5, %c0_6], %11 {strides = array<i32>} : memref<1x8x256xf32, #tpu.memory_space<vmem>>, vector<1x8x256xf32>,
    return
  }
  func.func @transform_0(%arg0: i32, %arg1: i32) -> (i32, i32, i32) {
    %c0_i32 = arith.constant 0 : i32
    %c0_i32_0 = arith.constant 0 : i32
    return %arg0, %c0_i32, %arg1 : i32, i32, i32
  }
  func.func @transform_1(%arg0: i32, %arg1: i32) -> (i32, i32, i32) {
    %c0_i32 = arith.constant 0 : i32
    %c0_i32_0 = arith.constant 0 : i32
    return %arg0, %c0_i32, %arg1 : i32, i32, i32
  }
}

</mosaic_0001>

<bundles_post_ra>
// kernel: tpu_custom_call.1
= control target key start
LH: loop header
LB: loop body
LE: loop exit
PB: predicated region body
PF: predicated region fallthrough
CT: control target
= control target key end

     0   :  { %6 = vsyncpa [#allocation3], 0  ;;  %s659_s0 = inlined_call_operand.hbm [shape: f32[2,8,256], index: 0, kind: input, shape index: {}]   ;;  %s660_s1 = inlined_call_operand.hbm [shape: f32[2,8,256], index: 1, kind: output, shape index: {}]  }
   0x1   :  { %8 = vsyncpa [#allocation3 + $0x1], 0 }
   0x2   :  { %9 = vsyncpa [#allocation4], 0 }
   0x3   :  { %11 = vsyncpa [#allocation4 + $0x1], 0  ;;  %s535_s6 = smov 0   ;;  %s537_s7 = smov 0  }
   0x4   :  { %s539_s8 = smov 0   ;;  %s541_s9 = smov 0  }
   0x5   :  { %s543_s10 = smov 0   ;;  %s545_s11 = smov 0  }
   0x6 LB: > { %s324_s12 = sadd.s32 4294967295, %s523_s11   ;;  %s325_s13 = sadd.s32 4294967294, %s523_s11   ;;  %s523_s11 = sphi %s545_s11, %s17_s11   ;;  %s519_s10 = sphi %s543_s10, %s669_s10   ;;  %s515_s9 = sphi %s541_s9, %s668_s9   ;;  %s511_s8 = sphi %s539_s8, %s667_s8   ;;  %s507_s7 = sphi %s537_s7, %s666_s7   ;;  %s503_s6 = sphi %s535_s6, %s665_s6  }
   0x7   : > { %s29_s14 = sadd.s32 1, %s519_s10  ;;  %s38_s15 = sadd.s32 1, %s511_s8 }
   0x8   : > { %p31_p0 = scmp.ge.s32.totalorder %s29_s14, 2  ;;  %p45_p1 = scmp.ne.s32.totalorder %s511_s8, %s507_s7 }
   0x9   : > { %p46_p2 = scmp.eq.s32.totalorder %s523_s11, 0  ;;  %p51_p3 = scmp.ne.s32.totalorder %s507_s7, %s503_s6 }
   0xa   : > { %s671_s14 = smov (%p31_p0, %s29_s14), 0  ;;  %p52_p5 = scmp.eq.s32.totalorder %s324_s12, 0 }
   0xb   : > { %p576_p4 = por %p46_p2, %p45_p1  ;;  %s33_s17 = ssub.s32 %s519_s10, %s671_s14 }
   0xc   : > { %p77_p6 = scmp.eq.s32.totalorder %s324_s12, 1  ;;  %p36_p7 = scmp.eq.s32.totalorder %s33_s17, 0 }
   0xd   : > { %p582_p8 = por %p52_p5, %p51_p3  ;;  %p83_p10 = scmp.eq.s32.totalorder %s325_s13, 1 }
   0xe   : > { %p586_p9 = por %p77_p6, %p45_p1  ;;  %p327_p12 = scmp.ge.s32.totalorder %s523_s11, 2 }
   0xf   : > { %s591_s20 = scalar_select %p36_p7, %s511_s8, %s38_s15  }
  0x10   : > { %p593_p11 = por %p83_p10, %p51_p3  ;;  %p353_p13 = scmp.lt.s32.totalorder %s523_s11, 2 }
  0x11   : > { %s103_s22 = sand.u32 1, %s511_s8   ;;  %s339_s24 = sshll.u32 %s519_s10, 4 }
  0x12   : > { %s328_s23 = sshll.u32 %s103_s22, 4  ;;  %s114_s27 = scalar_lea.hbm %s659_s0, %s339_s24 }
  0x13   : > { %s107_s28 = scalar_lea.vmem [#allocation2], %s328_s23  ;;  %s116_s30 = sshll.u32 %s114_s27, 4  ;;  %s117_s30 = int_to_ptr.hbm [resolvable:$true] %s116_s30 }
  0x14   : > { %s118_s29 = sshll.u32 %s107_s28, 4  ;;  %p346_p0 = pnand %p353_p13, %p576_p4  ;;  %s119_s29 = int_to_ptr.vmem [resolvable:$true] %s118_s29 }
  0x15   : > { %p331_p1 = scmp.ge.s32.totalorder %s523_s11, 1  ;;  %p123_p2 = scmp.lt.s32.totalorder %s523_s11, 3 }
  0x16   : > { %s104_s2 = scalar_lea.sflag [#allocation3], %s103_s22 }
  0x17   : > { %348 = dma.hbm_to_vmem [thread:$0]  (!%p346_p0), %s117_s30, 256, %s119_s29, %s104_s2  }
  0x18   : > { %p124_p3 = pnand %p331_p1, %p123_p2 }
  0x19   : > { %s609_s3 = sand.u32 (!%p124_p3), 1, %s507_s7  }
  0x1a   : > { %127 = sbr.rel (%p124_p3) target bundleno = 93 (0x5d), region = 24  ;;  %s332_s4 = sshll.u32 (!%p124_p3), %s609_s3, 4 }
  0x1b   : > { %s130_s5 = scalar_lea.sflag (!%p124_p3), [#allocation3], %s609_s3  ;;  %s133_s12 = scalar_lea.vmem (!%p124_p3), [#allocation2], %s332_s4 }
  0x1f   : > { %494 = dma.done.wait (%p582_p8), %s130_s5, 256  }
  0x20   : > { %496 = vsyncadd (%p582_p8), %s130_s5, 4294967040  ;;  %v155_v0 = vld [vmem:[%s133_s12] sm:$0xff]  ;;  %v156_v1 = vld [vmem:[%s133_s12 + $0x8] sm:$0xff]  ;;  %s340_s13 = sshll.u32 %s515_s9, 4  ;;  %s152_s9 = scalar_lea.vmem [#allocation5], %s332_s4 }
  0x21   : > { %v157_v2 = vrot.slane %v155_v0, 4  ;;  %v163_v3 = vrot.slane %v156_v1, 4  ;;  %s235_s17 = scalar_lea.hbm %s660_s1, %s340_s13  ;;  %s237_s18 = sshll.u32 %s152_s9, 4  ;;  %s238_s18 = int_to_ptr.vmem [resolvable:$true] %s237_s18 }
  0x22   : > { %s239_s22 = sshll.u32 %s235_s17, 4  ;;  %s222_s23 = scalar_lea.sflag [#allocation4], %s609_s3  ;;  %s240_s22 = int_to_ptr.hbm [resolvable:$true] %s239_s22 }
  0x23   : > { %v158_v4 = vmax.f32 %v155_v0, %v157_v2  ;;  %v164_v5 = vmax.f32 %v156_v1, %v163_v3  ;;  %s455_s24 = sshra.s32 %s240_s22, 4  ;;  %s461_s28 = scalar_lea.hbm %s660_s1, 32  ;;  %s456_s24 = int_to_ptr.hbm [resolvable:$true] %s455_s24 }
  0x24   : > { %s457_s25 = scalar_lea.hbm %s456_s24, 16  ;;  %p462_p7 = scmp.lt.s32.totalorder %s456_s24, %s660_s1 }
  0x25   : > { %v159_v6 = vrot.slane %v158_v4, 2  ;;  %v165_v7 = vrot.slane %v164_v5, 2  ;;  %p458_p4 = scmp.ne.s32.totalorder %s456_s24, %s457_s25  ;;  %p463_p8 = scmp.lt.s32.totalorder %s461_s28, %s457_s25 }
  0x27   : > { %v160_v8 = vmax.f32 %v158_v4, %v159_v6  ;;  %v166_v9 = vmax.f32 %v164_v5, %v165_v7  ;;  %p459_p5 = pnand %p458_p4, %p586_p9  ;;  %p464_p10 = por %p463_p8, %p462_p7 }
  0x29   : > { %v161_v10 = vrot.slane %v160_v8, 1  ;;  %v167_v11 = vrot.slane %v166_v9, 1  ;;  %p460_p6 = pneg %p459_p5 }
  0x2b   : > { %v162_v12 = vmax.f32 %v160_v8, %v161_v10  ;;  %v168_v13 = vmax.f32 %v166_v9, %v167_v11  ;;  %p465_p13 = pnand %p464_p10, %p460_p6 }
  0x2d   : > { %v169_v14 = vsub.f32 %v155_v0, %v162_v12  ;;  %v170_v15 = vsub.f32 %v156_v1, %v168_v13 }
  0x2f   : > { %v171_v16 = vmul.f32 1.442695, %v169_v14  ;;  %v173_v17 = vmul.f32 1.442695, %v170_v15 }
  0x31   : > { %403 = vpow2.f32 %v171_v16 }
  0x32   : > { %405 = vpow2.f32 %v173_v17 }
  0x37   : > { %v404_v18 = vpop.eup %403 }
  0x38   : > { %v406_v19 = vpop.eup %405  ;;  %v175_v20 = vrot.slane %v404_v18, 4 }
  0x39   : > { %v181_v21 = vrot.slane %v406_v19, 4 }
  0x3a   : > { %v176_v22 = vadd.f32 %v404_v18, %v175_v20 }
  0x3b   : > { %v182_v23 = vadd.f32 %v406_v19, %v181_v21 }
  0x3c   : > { %v177_v24 = vrot.slane %v176_v22, 2 }
  0x3d   : > { %v183_v25 = vrot.slane %v182_v23, 2 }
  0x3e   : > { %v178_v26 = vadd.f32 %v177_v24, %v176_v22 }
  0x3f   : > { %v184_v27 = vadd.f32 %v183_v25, %v182_v23 }
  0x40   : > { %v179_v28 = vrot.slane %v178_v26, 1 }
  0x41   : > { %v185_v29 = vrot.slane %v184_v27, 1 }
  0x42   : > { %v180_v30 = vadd.f32 %v179_v28, %v178_v26 }
  0x43   : > { %v186_v31 = vadd.f32 %v185_v29, %v184_v27 }
  0x44   : > { %407 = vrcp.f32 %v180_v30  ;;  %vm192_vm0 = vweird.f32 %v180_v30  ;;  %v198_v35 = vand.u32 2147483648, %v180_v30  ;;  %v196_v38 = vand.u32 2147483647, %v180_v30 }
  0x45   : > { %409 = vrcp.f32 %v186_v31  ;;  %v213_v39 = vand.u32 2147483648, %v186_v31  ;;  %vm207_vm2 = vweird.f32 %v186_v31  ;;  %v211_v41 = vand.u32 2147483647, %v186_v31 }
  0x46   : > { %v199_v43 = vor.u32 1.1754944e-38, %v198_v35  ;;  %vm197_vm5 = vcmp.eq.f32.partialorder %v196_v38, 8.507059e+37 }
  0x47   : > { %v214_v46 = vor.u32 1.1754944e-38, %v213_v39  ;;  %vm212_vm7 = vcmp.eq.f32.partialorder %v211_v41, 8.507059e+37 }
  0x4a   : > { %v408_v32 = vpop.eup %407 }
  0x4b   : > { %v410_v33 = vpop.eup %409  ;;  %v188_v34 = vmul.f32 %v408_v32, %v180_v30  ;;  %vm193_vm1 = vweird.f32 %v408_v32 }
  0x4c   : > { %v203_v36 = vmul.f32 %v410_v33, %v186_v31  ;;  %vm208_vm3 = vweird.f32 %v410_v33  ;;  %vm194_vm4 = vmor %vm192_vm0, %vm193_vm1 }
  0x4d   : > { %v189_v37 = vsub.f32 1.0, %v188_v34  ;;  %vm209_vm6 = vmor %vm207_vm2, %vm208_vm3 }
  0x4e   : > { %v204_v40 = vsub.f32 1.0, %v203_v36 }
  0x4f   : > { %v190_v42 = vmul.f32 %v408_v32, %v189_v37 }
  0x50   : > { %v205_v44 = vmul.f32 %v410_v33, %v204_v40 }
  0x51   : > { %v191_v45 = vadd.f32 %v408_v32, %v190_v42 }
  0x52   : > { %v206_v47 = vadd.f32 %v410_v33, %v205_v44 }
  0x53   : > { %v195_v48 = vsel %vm194_vm4, %v408_v32, %v191_v45 }
  0x54   : > { %v200_v49 = vsel %vm197_vm5, %v199_v43, %v195_v48  ;;  %v210_v50 = vsel %vm209_vm6, %v410_v33, %v206_v47 }
  0x55   : > { %v201_v51 = vmul.f32 2.0, %v200_v49  ;;  %v215_v52 = vsel %vm212_vm7, %v214_v46, %v210_v50 }
  0x56   : > { %v216_v53 = vmul.f32 2.0, %v215_v52 }
  0x57   : > { %v217_v54 = vmul.f32 %v404_v18, %v201_v51 }
  0x58   : > { %v218_v55 = vmul.f32 %v406_v19, %v216_v53 }
  0x59   : > { %219 = vst [vmem:[%s152_s9] sm:$0xff] %v217_v54 }
  0x5a   : > { %220 = vst [vmem:[%s152_s9 + $0x8] sm:$0xff] %v218_v55 }
  0x5b   : > { %468 = shalt.err (!%p465_p13)
}
  0x5c   : > { %343 = dma.vmem_to_hbm [thread:$0]  (%p586_p9), %s238_s18, 256, %s240_s22, %s222_s23  }
  0x5d PF: > { %s251_s2 = sand.u32 1, %s503_s6   ;;  %p350_p0 = pnand %p327_p12, %p593_p11 }
  0x5e   : > { %s252_s3 = scalar_lea.sflag [#allocation4], %s251_s2 }
  0x5f   : > { %p351_p1 = pneg %p350_p0 }
  0x61   : > { %498 = dma.done.wait (%p351_p1), %s252_s3, 256  }
  0x62   : > { %500 = vsyncadd (%p351_p1), %s252_s3, 4294967040  ;;  %s17_s11 = sadd.s32 1, %s523_s11   ;;  %s665_s6 = smov %s507_s7 }
  0x63   : > { %p14_p2 = scmp.ge.s32.totalorder %s17_s11, 4   ;;  %s666_s7 = smov %s511_s8 }
  0x64   : > { %s667_s8 = smov %s591_s20  ;;  %s668_s9 = smov %s519_s10 }
  0x65   : > { %s669_s10 = smov %s671_s14  ;;  %16 = sbr.rel (!%p14_p2) target bundleno = 6 (0x6), region = 69 }
  0x6a   :  { %258 = vsyncpa [#allocation3], 1 }
  0x6b   :  { %260 = vsyncpa [#allocation3 + $0x1], 1 }
  0x6c   :  { %261 = vsyncpa [#allocation4], 1 }
  0x6d   :  { %263 = vsyncpa [#allocation4 + $0x1], 1 }

</bundles_post_ra>
